<compile_context>
chip_gen: v6e
topology: v6e:2x2x1
jax: 0.10.0
libtpu: 0.0.40
codegen_flags: <defaults>
</compile_context>

<pallas_src>
import jax
import jax.numpy as jnp
from jax.experimental import pallas as pl
from jax.experimental.pallas import tpu as pltpu

INPUT_SHAPE = 64     # kwargs['input_shape'] in the PyTorch module
ENCODING_DIM = 32    # stand-in for the (degenerate) global encoding_dim
BATCH = 16


def _ae_kernel(x_ref,
               w1_ref, b1_ref,
               w2_ref, b2_ref,
               w3_ref, b3_ref,
               w4_ref, b4_ref,
               o_ref):
    # MXU inputs in bf16, accumulation + elementwise in f32.
    x = x_ref[...].astype(jnp.bfloat16)

    # encoder hidden: Linear + ReLU
    h = jnp.dot(x, w1_ref[...], preferred_element_type=jnp.float32) + b1_ref[...]
    h = jnp.maximum(h, 0.0)

    # encoder output: Linear + sigmoid
    code = jnp.dot(h.astype(jnp.bfloat16), w2_ref[...],
                   preferred_element_type=jnp.float32) + b2_ref[...]
    code = jax.nn.sigmoid(code)

    # decoder hidden: Linear + ReLU
    d = jnp.dot(code.astype(jnp.bfloat16), w3_ref[...],
                preferred_element_type=jnp.float32) + b3_ref[...]
    d = jnp.maximum(d, 0.0)

    # decoder output: Linear + sigmoid
    out = jnp.dot(d.astype(jnp.bfloat16), w4_ref[...],
                  preferred_element_type=jnp.float32) + b4_ref[...]
    o_ref[...] = jax.nn.sigmoid(out).astype(o_ref.dtype)


def ae_forward(x, params):
    """x: [B, INPUT_SHAPE] float32. params: dict of transposed bf16 weights + f32 biases."""
    B, D = x.shape

    # Single invocation, no grid: every operand lives whole in VMEM, fetched once.
    def vmem_spec():
        return pl.BlockSpec(memory_space=pltpu.MemorySpace.VMEM)

    return pl.pallas_call(
        _ae_kernel,
        out_shape=jax.ShapeDtypeStruct((B, D), x.dtype),
        in_specs=[vmem_spec() for _ in range(9)],
        out_specs=vmem_spec(),
    )(x,
      params["w1"], params["b1"],
      params["w2"], params["b2"],
      params["w3"], params["b3"],
      params["w4"], params["b4"])


def init_params(key, input_shape=INPUT_SHAPE, encoding_dim=ENCODING_DIM):
    """Deterministic init mimicking nn.Linear's U(-1/sqrt(fan_in), 1/sqrt(fan_in)).
    Weights are stored transposed ([in, out]) and in bf16 for the MXU path;
    biases stay f32 (added post-accumulation)."""
    ks = jax.random.split(key, 8)

    def lin(kw, kb, fan_in, fan_out):
        bound = 1.0 / jnp.sqrt(jnp.float32(fan_in))
        w = jax.random.uniform(kw, (fan_in, fan_out), jnp.float32, -bound, bound)
        b = jax.random.uniform(kb, (1, fan_out), jnp.float32, -bound, bound)
        return w.astype(jnp.bfloat16), b

    w1, b1 = lin(ks[0], ks[1], input_shape, encoding_dim)   # encoder hidden
    w2, b2 = lin(ks[2], ks[3], encoding_dim, encoding_dim)  # encoder output
    w3, b3 = lin(ks[4], ks[5], encoding_dim, encoding_dim)  # decoder hidden
    w4, b4 = lin(ks[6], ks[7], encoding_dim, input_shape)   # decoder output
    return dict(w1=w1, b1=b1, w2=w2, b2=b2, w3=w3, b3=b3, w4=w4, b4=b4)


def ae_forward_ref(x, p):
    """Pure-JAX reference (bf16 matmul inputs, f32 accumulation) mirroring the kernel."""
    def dot(a, w):
        return jnp.dot(a.astype(jnp.bfloat16), w, preferred_element_type=jnp.float32)

    h = jnp.maximum(dot(x, p["w1"]) + p["b1"], 0.0)
    c = jax.nn.sigmoid(dot(h, p["w2"]) + p["b2"])
    d = jnp.maximum(dot(c, p["w3"]) + p["b3"], 0.0)
    return jax.nn.sigmoid(dot(d, p["w4"]) + p["b4"])


if __name__ == "__main__":
    key = jax.random.PRNGKey(0)
    k_x, k_p = jax.random.split(key)

    x = jax.random.normal(k_x, (BATCH, INPUT_SHAPE), jnp.float32)
    params = init_params(k_p)

    out = ae_forward(x, params)
    out = jax.block_until_ready(out)

    ref = ae_forward_ref(x, params)
    assert out.shape == (BATCH, INPUT_SHAPE)
    # bf16 MXU inputs -> loosen tolerance vs the bf16-matched reference.
    assert jnp.allclose(out, ref, atol=2e-2, rtol=2e-2), "mismatch vs reference"

    print("KERNEL_OK")
</pallas_src>

<mosaic_0001>
module attributes {stable_mosaic.version = 11 : i64} {
  func.func @_ae_kernel(%arg0: memref<16x64xf32, #tpu.memory_space<vmem>>, %arg1: memref<64x32xbf16, #tpu.memory_space<vmem>>, %arg2: memref<1x32xf32, #tpu.memory_space<vmem>>, %arg3: memref<32x32xbf16, #tpu.memory_space<vmem>>, %arg4: memref<1x32xf32, #tpu.memory_space<vmem>>, %arg5: memref<32x32xbf16, #tpu.memory_space<vmem>>, %arg6: memref<1x32xf32, #tpu.memory_space<vmem>>, %arg7: memref<32x64xbf16, #tpu.memory_space<vmem>>, %arg8: memref<1x64xf32, #tpu.memory_space<vmem>>, %arg9: memref<16x64xf32, #tpu.memory_space<vmem>>) attributes {dimension_semantics = [], scalar_prefetch = 0 : i64, scratch_operands = 0 : i64, tpu.core_type = #tpu.core_type<tc>} {
    %c0 = arith.constant 0 : index
    %c0_0 = arith.constant 0 : index
    %0 = vector.load %arg0[%c0, %c0_0] : memref<16x64xf32, #tpu.memory_space<vmem>>, vector<16x64xf32>
    %1 = arith.truncf %0 : vector<16x64xf32> to vector<16x64xbf16>
    %c0_1 = arith.constant 0 : index
    %c0_2 = arith.constant 0 : index
    %2 = vector.load %arg1[%c0_1, %c0_2] : memref<64x32xbf16, #tpu.memory_space<vmem>>, vector<64x32xbf16>
    %cst = arith.constant dense<0.000000e+00> : vector<16x32xf32>
    %3 = tpu.matmul %1, %2, %cst {dimension_numbers = #tpu.dot_dimension_numbers<[1], [0], [0], [1], [0, 0, 1, 1], [], []>} : vector<16x64xbf16>, vector<64x32xbf16>, vector<16x32xf32> -> vector<16x32xf32>
    %c0_3 = arith.constant 0 : index
    %c0_4 = arith.constant 0 : index
    %4 = vector.load %arg2[%c0_3, %c0_4] : memref<1x32xf32, #tpu.memory_space<vmem>>, vector<1x32xf32>
    %5 = vector.broadcast %4 : vector<1x32xf32> to vector<16x32xf32>
    %6 = arith.addf %3, %5 : vector<16x32xf32>
    %cst_5 = arith.constant 0.000000e+00 : f32
    %7 = vector.broadcast %cst_5 : f32 to vector<16x32xf32>
    %8 = arith.maximumf %6, %7 : vector<16x32xf32>
    %9 = arith.truncf %8 : vector<16x32xf32> to vector<16x32xbf16>
    %c0_6 = arith.constant 0 : index
    %c0_7 = arith.constant 0 : index
    %10 = vector.load %arg3[%c0_6, %c0_7] : memref<32x32xbf16, #tpu.memory_space<vmem>>, vector<32x32xbf16>
    %cst_8 = arith.constant dense<0.000000e+00> : vector<16x32xf32>
    %11 = tpu.matmul %9, %10, %cst_8 {dimension_numbers = #tpu.dot_dimension_numbers<[1], [0], [0], [1], [0, 0, 1, 1], [], []>} : vector<16x32xbf16>, vector<32x32xbf16>, vector<16x32xf32> -> vector<16x32xf32>
    %c0_9 = arith.constant 0 : index
    %c0_10 = arith.constant 0 : index
    %12 = vector.load %arg4[%c0_9, %c0_10] : memref<1x32xf32, #tpu.memory_space<vmem>>, vector<1x32xf32>
    %13 = vector.broadcast %12 : vector<1x32xf32> to vector<16x32xf32>
    %14 = arith.addf %11, %13 : vector<16x32xf32>
    %15 = arith.negf %14 : vector<16x32xf32>
    %16 = math.exp %15 : vector<16x32xf32>
    %cst_11 = arith.constant 1.000000e+00 : f32
    %17 = vector.broadcast %cst_11 : f32 to vector<16x32xf32>
    %18 = arith.addf %17, %16 : vector<16x32xf32>
    %19 = arith.divf %17, %18 : vector<16x32xf32>
    %20 = arith.truncf %19 : vector<16x32xf32> to vector<16x32xbf16>
    %c0_12 = arith.constant 0 : index
    %c0_13 = arith.constant 0 : index
    %21 = vector.load %arg5[%c0_12, %c0_13] : memref<32x32xbf16, #tpu.memory_space<vmem>>, vector<32x32xbf16>
    %cst_14 = arith.constant dense<0.000000e+00> : vector<16x32xf32>
    %22 = tpu.matmul %20, %21, %cst_14 {dimension_numbers = #tpu.dot_dimension_numbers<[1], [0], [0], [1], [0, 0, 1, 1], [], []>} : vector<16x32xbf16>, vector<32x32xbf16>, vector<16x32xf32> -> vector<16x32xf32>
    %c0_15 = arith.constant 0 : index
    %c0_16 = arith.constant 0 : index
    %23 = vector.load %arg6[%c0_15, %c0_16] : memref<1x32xf32, #tpu.memory_space<vmem>>, vector<1x32xf32>
    %24 = vector.broadcast %23 : vector<1x32xf32> to vector<16x32xf32>
    %25 = arith.addf %22, %24 : vector<16x32xf32>
    %cst_17 = arith.constant 0.000000e+00 : f32
    %26 = vector.broadcast %cst_17 : f32 to vector<16x32xf32>
    %27 = arith.maximumf %25, %26 : vector<16x32xf32>
    %28 = arith.truncf %27 : vector<16x32xf32> to vector<16x32xbf16>
    %c0_18 = arith.constant 0 : index
    %c0_19 = arith.constant 0 : index
    %29 = vector.load %arg7[%c0_18, %c0_19] : memref<32x64xbf16, #tpu.memory_space<vmem>>, vector<32x64xbf16>
    %cst_20 = arith.constant dense<0.000000e+00> : vector<16x64xf32>
    %30 = tpu.matmul %28, %29, %cst_20 {dimension_numbers = #tpu.dot_dimension_numbers<[1], [0], [0], [1], [0, 0, 1, 1], [], []>} : vector<16x32xbf16>, vector<32x64xbf16>, vector<16x64xf32> -> vector<16x64xf32>
    %c0_21 = arith.constant 0 : index
    %c0_22 = arith.constant 0 : index
    %31 = vector.load %arg8[%c0_21, %c0_22] : memref<1x64xf32, #tpu.memory_space<vmem>>, vector<1x64xf32>
    %32 = vector.broadcast %31 : vector<1x64xf32> to vector<16x64xf32>
    %33 = arith.addf %30, %32 : vector<16x64xf32>
    %34 = arith.negf %33 : vector<16x64xf32>
    %35 = math.exp %34 : vector<16x64xf32>
    %cst_23 = arith.constant 1.000000e+00 : f32
    %36 = vector.broadcast %cst_23 : f32 to vector<16x64xf32>
    %37 = arith.addf %36, %35 : vector<16x64xf32>
    %38 = arith.divf %36, %37 : vector<16x64xf32>
    %c0_24 = arith.constant 0 : index
    %c0_25 = arith.constant 0 : index
    %39 = vector.load %arg9[%c0_24, %c0_25] : memref<16x64xf32, #tpu.memory_space<vmem>>, vector<16x64xf32>
    tpu.vector_store %arg9[%c0_24, %c0_25], %38 {strides = array<i32>} : memref<16x64xf32, #tpu.memory_space<vmem>>, vector<16x64xf32>,
    return
  }
}

</mosaic_0001>

<bundles_post_ra>
// kernel: tpu_custom_call.1
= control target key start
LH: loop header
LB: loop body
LE: loop exit
PB: predicated region body
PF: predicated region fallthrough
CT: control target
= control target key end

     0   :  { %14 = vsyncpa [#allocation3], 0  ;;  %s667_s0 = inlined_call_operand.vmem [shape: f32[16,64], index: 0, kind: input, shape index: {}]   ;;  %s668_s1 = inlined_call_operand.vmem [shape: bf16[64,32], index: 1, kind: input, shape index: {}]   ;;  %s669_s2 = inlined_call_operand.vmem [shape: f32[1,32], index: 2, kind: input, shape index: {}]   ;;  %s670_s3 = inlined_call_operand.vmem [shape: bf16[32,32], index: 3, kind: input, shape index: {}]   ;;  %s671_s4 = inlined_call_operand.vmem [shape: f32[1,32], index: 4, kind: input, shape index: {}]   ;;  %s672_s5 = inlined_call_operand.vmem [shape: bf16[32,32], index: 5, kind: input, shape index: {}]   ;;  %s673_s6 = inlined_call_operand.vmem [shape: f32[1,32], index: 6, kind: input, shape index: {}]   ;;  %s674_s7 = inlined_call_operand.hbm [shape: bf16[32,64], index: 7, kind: input, shape index: {}]   ;;  %s675_s8 = inlined_call_operand.vmem [shape: f32[1,64], index: 8, kind: input, shape index: {}]   ;;  %s676_s9 = inlined_call_operand.hbm [shape: f32[16,64], index: 9, kind: output, shape index: {}]  }
   0x1   :  { %15 = vsyncpa [#allocation4], 0  ;;  %s537_s30 = smov [#allocation2]  }
   0x2   :  { %s35_s10 = sshll.u32 %s537_s30, 4  ;;  %s36_s10 = int_to_ptr.vmem [resolvable:$true] %s35_s10 }
   0x3   :  { %s501_s11 = scalar_lea.vmem %s36_s10, 256  ;;  %p506_p1 = scmp.lt.s32.totalorder %s36_s10, %s36_s10 }
   0x4   :  { %p502_p0 = scmp.ne.s32.totalorder %s36_s10, %s501_s11  ;;  %p507_p2 = scmp.lt.s32.totalorder %s501_s11, %s501_s11 }
   0x6   :  { %p508_p3 = por %p507_p2, %p506_p1 }
   0x8   :  { %p509_p4 = pnand %p508_p3, %p502_p0 }
   0xa   :  { %512 = shalt.err (!%p509_p4)
}
   0xb   :  { %s538_s12 = smov 64   ;;  %s539_s13 = smov 4  }
   0xc   :  { %41 = dma.hbm_to_vmem [thread:$0]  %s674_s7, 256, %s36_s10, [#allocation3], %s538_s12, %s538_s12, %s539_s13  }
   0xd   :  { %533 = dma.done.wait [#allocation3], 256  }
   0xe   :  { %534 = vsyncadd [#allocation3], 4294967040  ;;  %v540_v0 = vmov 0.0   ;;  %vm541_vm0 = vmmov 0   ;;  %v467_v1 = vld [vmem:[%s668_s1 + $0x18] sm:$0xff]   ;;  %v468_v2 = vld [vmem:[%s668_s1 + $0x10] sm:$0xff]  }
   0xf   :  { %423 = vmatprep.subr.bf16.mxu0 %v540_v0  ;;  %431 = vmatprep.mubr.msk.bf16.mxu0 %vm541_vm0, %v540_v0  ;;  %v469_v3 = vld [vmem:[%s668_s1 + $0x8] sm:$0xff]   ;;  %v470_v4 = vld [vmem:[%s668_s1] sm:$0xff]   ;;  %vm90_vm1 = vcmask 523264   ;;  %vm161_vm2 = vcmask 261120  }
  0x10   :  { %435 = vmatprep.subr.bf16.mxu1 %v540_v0  ;;  %439 = vmatprep.mubr.msk.bf16.mxu1 %vm541_vm0, %v540_v0  ;;  %v48_v5 = vld [vmem:[%s667_s0] sm:$0xff]  ;;  %v49_v6 = vld [vmem:[%s667_s0 + $0x8] sm:$0xff] }
  0x11   :  { %424 = vmatpush3.bf16.msra.mxu0 %v467_v1  ;;  %v50_v7 = vpack.c.bf16 %v49_v6, %v48_v5  ;;  %v471_v8 = vld [vmem:[%s670_s3 + $0x8] sm:$0xff]   ;;  %v472_v9 = vld [vmem:[%s670_s3] sm:$0xff]  }
  0x12   :  { %425 = vmatprep.subr.bf16.mxu0 %v540_v0  ;;  %436 = vmatpush3.bf16.msra.mxu1 %v471_v8  ;;  %v387_v10 = vld [vmem:[%s669_s2] ss:$0 sm:$0xff]  ;;  %v473_v20 = vld [vmem:[%s672_s5 + $0x8] sm:$0xff]  }
  0x13   :  { %437 = vmatprep.subr.bf16.mxu1 %v540_v0  ;;  %v474_v21 = vld [vmem:[%s672_s5] sm:$0xff]   ;;  %v475_v38 = vld [vmem:[#allocation2 + $0x8] sm:$0xff]  }
  0x14   :  { %v393_v22 = vld [vmem:[%s671_s4] ss:$0 sm:$0xff] }
  0x15   :  { %426 = vmatpush3.bf16.msra.mxu0 %v468_v2  ;;  %v476_v39 = vld [vmem:[#allocation2] sm:$0xff]  }
  0x16   :  { %427 = vmatprep.subr.bf16.mxu0 %v540_v0  ;;  %438 = vmatpush3.bf16.msra.mxu1 %v472_v9  ;;  %v399_v40 = vld [vmem:[%s673_s6] ss:$0 sm:$0xff]  ;;  %s542_s6 = smov [#allocation5]  }
  0x17   :  { %443 = vmatprep.subr.bf16.mxu1 %v540_v0  ;;  %v403_v50 = vld [vmem:[%s675_s8] ss:$0 sm:$0xff]  ;;  %s375_s16 = sshll.u32 %s542_s6, 4  ;;  %s376_s16 = int_to_ptr.vmem [resolvable:$true] %s375_s16 }
  0x18   :  { %s513_s8 = scalar_lea.vmem %s376_s16, 256  ;;  %p518_p6 = scmp.lt.s32.totalorder %s376_s16, %s376_s16 }
  0x19   :  { %428 = vmatpush3.bf16.msra.mxu0 %v469_v3  ;;  %p514_p5 = scmp.ne.s32.totalorder %s376_s16, %s513_s8  ;;  %p519_p7 = scmp.lt.s32.totalorder %s513_s8, %s513_s8 }
  0x1a   :  { %429 = vmatprep.subr.bf16.mxu0 %v540_v0 }
  0x1b   :  { %p520_p8 = por %p519_p7, %p518_p6 }
  0x1d   :  { %430 = vmatpush3.bf16.msra.mxu0 %v470_v4  ;;  %p521_p9 = pnand %p520_p8, %p514_p5 }
  0x1e   :  { %451 = vmatprep.subr.bf16.mxu0 %v540_v0 }
  0x20   :  { %432 = vmatmul.mubr.msk.bf16.vlgmr.msra.gmra.mxu0 %vm90_vm1, %v50_v7 }
  0x21   :  { %455 = vmatprep.mubr.msk.bf16.mxu0 %vm541_vm0, %v540_v0  ;;  %452 = vmatpush3.bf16.msra.mxu0 %v475_v38 }
  0x22   :  { %453 = vmatprep.subr.bf16.mxu0 %v540_v0 }
  0x25   :  { %454 = vmatpush3.bf16.msra.mxu0 %v476_v39 }
  0xe0   :  { %v128_v11 = vpop.f32.mrf.mxu0 }
  0xe1   :  { %v129_v13 = vadd.f32 %v387_v10, %v128_v11 }
  0xe2   :  { %v433_v12 = vpop.f32.mrf.mxu0 }
  0xe3   :  { %v135_v17 = vmax.f32 %v129_v13, 0.0 }
  0xe4   :  { %v131_v14 = vpop.f32.mrf.mxu0 }
  0xe5   :  { %v132_v15 = vadd.f32 %v387_v10, %v131_v14 }
  0xe6   :  { %v434_v16 = vpop.f32.mrf.mxu0 }
  0xe7   :  { %v136_v18 = vmax.f32 %v132_v15, 0.0 }
  0xe9   :  { %v137_v19 = vpack.c.bf16 %v136_v18, %v135_v17 }
  0xeb   :  { %440 = vmatmul.mubr.msk.bf16.vlgmr.msra.gmra.mxu1 %vm161_vm2, %v137_v19 }
  0xec   :  { %447 = vmatprep.mubr.msk.bf16.mxu1 %vm541_vm0, %v540_v0  ;;  %444 = vmatpush3.bf16.msra.mxu1 %v473_v20 }
  0xed   :  { %445 = vmatprep.subr.bf16.mxu1 %v540_v0 }
  0xf0   :  { %446 = vmatpush3.bf16.msra.mxu1 %v474_v21 }
 0x1ab   :  { %v199_v23 = vpop.f32.mrf.mxu1 }
 0x1ac   :  { %v200_v24 = vadd.f32 %v393_v22, %v199_v23 }
 0x1ad   :  { %v441_v25 = vpop.f32.mrf.mxu1 }
 0x1ae   :  { %v397_v26 = vmul.f32 -1.442695, %v200_v24 }
 0x1af   :  { %v202_v27 = vpop.f32.mrf.mxu1 }
 0x1b0   :  { %477 = vpow2.f32 %v397_v26  ;;  %v203_v28 = vadd.f32 %v393_v22, %v202_v27 }
 0x1b1   :  { %v442_v29 = vpop.f32.mrf.mxu1 }
 0x1b2   :  { %v398_v30 = vmul.f32 -1.442695, %v203_v28 }
 0x1b4   :  { %479 = vpow2.f32 %v398_v30 }
 0x1bd   :  { %v478_v31 = vpop.eup %477 }
 0x1be   :  { %v212_v32 = vadd.f32 1.0, %v478_v31 }
 0x1c0   :  { %481 = vrcp.f32 %v212_v32 }
 0x1c1   :  { %v480_v33 = vpop.eup %479 }
 0x1c2   :  { %v213_v34 = vadd.f32 1.0, %v480_v33 }
 0x1c4   :  { %483 = vrcp.f32 %v213_v34 }
 0x1cd   :  { %v482_v35 = vpop.eup %481 }
 0x1d1   :  { %v484_v36 = vpop.eup %483 }
 0x1d2   :  { %v218_v37 = vpack.c.bf16 %v484_v36, %v482_v35 }
 0x1d4   :  { %448 = vmatmul.mubr.msk.bf16.vlgmr.msra.gmra.mxu1 %vm161_vm2, %v218_v37 }
 0x294   :  { %v279_v41 = vpop.f32.mrf.mxu1 }
 0x295   :  { %v280_v43 = vadd.f32 %v399_v40, %v279_v41 }
 0x296   :  { %v449_v42 = vpop.f32.mrf.mxu1 }
 0x297   :  { %v286_v47 = vmax.f32 %v280_v43, 0.0 }
 0x298   :  { %v282_v44 = vpop.f32.mrf.mxu1 }
 0x299   :  { %v283_v45 = vadd.f32 %v399_v40, %v282_v44 }
 0x29a   :  { %v450_v46 = vpop.f32.mrf.mxu1 }
 0x29b   :  { %v287_v48 = vmax.f32 %v283_v45, 0.0 }
 0x29d   :  { %v288_v49 = vpack.c.bf16 %v287_v48, %v286_v47 }
 0x29f   :  { %456 = vmatmul.mubr.msk.bf16.vlgmr.msra.gmra.mxu0 %vm161_vm2, %v288_v49 }
 0x35f   :  { %v349_v51 = vpop.f32.mrf.mxu0 }
 0x360   :  { %v350_v52 = vadd.f32 %v403_v50, %v349_v51 }
 0x361   :  { %v457_v53 = vpop.f32.mrf.mxu0 }
 0x362   :  { %v407_v54 = vmul.f32 -1.442695, %v350_v52 }
 0x363   :  { %v352_v55 = vpop.f32.mrf.mxu0 }
 0x364   :  { %485 = vpow2.f32 %v407_v54  ;;  %v353_v56 = vadd.f32 %v403_v50, %v352_v55 }
 0x365   :  { %v458_v57 = vpop.f32.mrf.mxu0 }
 0x366   :  { %v408_v58 = vmul.f32 -1.442695, %v353_v56 }
 0x368   :  { %487 = vpow2.f32 %v408_v58 }
 0x371   :  { %v486_v59 = vpop.eup %485 }
 0x372   :  { %v362_v60 = vadd.f32 1.0, %v486_v59 }
 0x374   :  { %489 = vrcp.f32 %v362_v60 }
 0x375   :  { %v488_v61 = vpop.eup %487 }
 0x376   :  { %v363_v62 = vadd.f32 1.0, %v488_v61 }
 0x378   :  { %491 = vrcp.f32 %v363_v62 }
 0x381   :  { %v490_v63 = vpop.eup %489 }
 0x382   :  { %368 = vst.msk [vmem:[#allocation5] sm:$0xff] %vm90_vm1, %v490_v63 }
 0x385   :  { %v492_v0 = vpop.eup %491 }
 0x386   :  { %369 = vst.msk [vmem:[#allocation5 + $0x8] sm:$0xff] %vm90_vm1, %v492_v0 }
 0x387   :  { %524 = shalt.err (!%p521_p9)
}
 0x388   :  { %s543_s17 = smov 128   ;;  %s544_s7 = smov 8  }
 0x389   :  { %381 = dma.vmem_to_hbm [thread:$0]  %s376_s16, 256, %s676_s9, [#allocation4], %s543_s17, %s543_s17, %s544_s7  }
 0x38a   :  { %535 = dma.done.wait [#allocation4], 256  }
 0x38b   :  { %536 = vsyncadd [#allocation4], 4294967040 }
 0x38c   :  { %385 = vsyncpa [#allocation3], 1 }
 0x38d   :  { %386 = vsyncpa [#allocation4], 1 }

</bundles_post_ra>
